<compile_context>
chip_gen: v7x
topology: tpu7x:2x2x1
jax: 0.10.0
libtpu: 0.0.40
codegen_flags: <defaults>
</compile_context>

<pallas_src>
import jax
import jax.numpy as jnp
from jax.experimental import pallas as pl
from jax.experimental.pallas import tpu as pltpu


def _dma_copy_kernel(x_hbm, o_hbm, sem):
    # x_hbm / o_hbm are (n_chunks, rows, cols) refs left in HBM (memory_space
    # = pl.ANY).  Each grid step copies one contiguous chunk HBM->HBM with a
    # single DMA — no VMEM staging, no vld/vst, no tiling constraints.
    i = pl.program_id(0)
    cp = pltpu.make_async_copy(x_hbm.at[i], o_hbm.at[i], sem)
    cp.start()
    cp.wait()


def _chunk_layout(total: int, itemsize: int):
    """Factor the flat copy as (n_chunks, rows, cols).

    cols is a lane-friendly multiple of 128 when possible (cosmetic for a pure
    DMA — each chunk is a contiguous HBM byte range either way).  Two chunks
    are used only when the array is big enough (>= 512 KiB) and splits evenly,
    so v7x's two TensorCores can each issue a DMA on half of the data.
    """
    cols = total
    for c in (1024, 512, 256, 128):
        if total % c == 0:
            cols = c
            break
    rows = total // cols
    if rows % 2 == 0 and total * itemsize >= (512 * 1024):
        return 2, rows // 2, cols
    return 1, rows, cols


def _pallas_hbm_copy(x: jax.Array, out_shape: tuple) -> jax.Array:
    total = x.size
    itemsize = jnp.dtype(x.dtype).itemsize
    n_chunks, rows, cols = _chunk_layout(total, itemsize)

    # Wrapper-side reshape: free metadata plumbing (element order unchanged),
    # so the kernel sees exactly the squeezed data laid out as chunks.
    x3d = x.reshape(n_chunks, rows, cols)

    y3d = pl.pallas_call(
        _dma_copy_kernel,
        out_shape=jax.ShapeDtypeStruct((n_chunks, rows, cols), x.dtype),
        grid=(n_chunks,),
        in_specs=[pl.BlockSpec(memory_space=pl.ANY)],   # raw HBM ref, no auto-DMA
        out_specs=pl.BlockSpec(memory_space=pl.ANY),    # raw HBM ref, no auto-DMA
        scratch_shapes=[pltpu.SemaphoreType.DMA(())],
        compiler_params=pltpu.CompilerParams(
            dimension_semantics=("parallel",),          # shard chunks across TCs (v7x)
        ),
        cost_estimate=pl.CostEstimate(
            flops=0,
            transcendentals=0,
            bytes_accessed=2 * total * itemsize,        # read + write, pure bandwidth
        ),
    )(x3d)

    return y3d.reshape(out_shape)


def squeeze_item(x: jax.Array, squeeze_index: int, use_pallas: bool = False) -> jax.Array:
    """Pallas/JAX equivalent of SqueezeItem(squeeze_index)(x).

    Default path (use_pallas=False) is the zero-copy lax.squeeze — squeeze is
    metadata-only, so no kernel should run.  use_pallas=True performs the same
    operation as an explicit HBM->HBM DMA copy kernel (full HBM round-trip at
    the memory roofline, zero VMEM footprint).
    """
    ndim = x.ndim
    idx = squeeze_index if squeeze_index >= 0 else squeeze_index + ndim
    if not (0 <= idx < ndim):
        raise ValueError(f"squeeze_index {squeeze_index} out of range for ndim {ndim}")

    # torch.squeeze(dim) is a no-op if that dim is not size 1.
    if x.shape[idx] != 1:
        return x

    out_shape = tuple(d for i, d in enumerate(x.shape) if i != idx)

    if not use_pallas or x.size == 0:
        # Roofline-optimal: 0 bytes of HBM traffic, lowered to a bitcast.
        return jax.lax.squeeze(x, (idx,))

    return _pallas_hbm_copy(x, out_shape)


if __name__ == "__main__":
    key = jax.random.PRNGKey(0)
    k1, k2, k3 = jax.random.split(key, 3)

    # NCHW tensor with singleton channel dim: (2, 1, 16, 16) -> (2, 16, 16)
    x = jax.random.normal(k1, (2, 1, 16, 16), dtype=jnp.float32)
    y = jax.block_until_ready(squeeze_item(x, 1, use_pallas=True))
    y_ref = jnp.squeeze(x, axis=1)
    assert y.shape == y_ref.shape == (2, 16, 16), (y.shape, y_ref.shape)
    assert jnp.array_equal(y, y_ref), "mismatch vs reference squeeze (axis=1)"

    # Trailing-dim squeeze: (2, 4, 16, 1) -> (2, 4, 16)
    x2 = jax.random.normal(k2, (2, 4, 16, 1), dtype=jnp.float32)
    y2 = jax.block_until_ready(squeeze_item(x2, -1, use_pallas=True))
    assert jnp.array_equal(y2, jnp.squeeze(x2, axis=-1)), "mismatch (axis=-1)"

    # Larger input exercising the 2-chunk "parallel" DMA path (v7x 2-TC split).
    x3 = jax.random.normal(k3, (2, 1, 256, 256), dtype=jnp.float32)
    y3 = jax.block_until_ready(squeeze_item(x3, 1, use_pallas=True))
    assert jnp.array_equal(y3, jnp.squeeze(x3, axis=1)), "mismatch (2-chunk DMA path)"

    # Default zero-copy production path.
    y4 = jax.block_until_ready(squeeze_item(x, 1, use_pallas=False))
    assert jnp.array_equal(y4, y_ref), "mismatch (zero-copy path)"

    # No-op when the dim isn't size 1 (torch.squeeze(dim) semantics).
    x5 = jax.random.normal(jax.random.PRNGKey(4), (2, 4, 16, 16), dtype=jnp.float32)
    y5 = squeeze_item(x5, 1, use_pallas=True)
    assert y5.shape == x5.shape

    print("KERNEL_OK")
</pallas_src>

<mosaic_0001>
module attributes {stable_mosaic.version = 11 : i64} {
  func.func @_dma_copy_kernel(%arg0: i32, %arg1: memref<1x1x512xf32, #tpu.memory_space<any>>, %arg2: memref<1x1x512xf32, #tpu.memory_space<any>>, %arg3: memref<!tpu.dma_semaphore, #tpu.memory_space<semaphore_mem>>) attributes {dimension_semantics = [#tpu.dimension_semantics<parallel>], iteration_bounds = array<i64: 1>, scalar_prefetch = 0 : i64, scratch_operands = 1 : i64, tpu.core_type = #tpu.core_type<tc>, window_params = [{}, {}]} {
    %c0_i32 = arith.constant 0 : i32
    %c0_i32_0 = arith.constant 0 : i32
    %0 = tpu.memref_slice %arg1[%arg0, %c0_i32, %c0_i32_0] : memref<1x1x512xf32, #tpu.memory_space<any>> -> memref<1x1x512xf32, #tpu.memory_space<any>>
    %1 = tpu.memref_squeeze %0 : memref<1x1x512xf32, #tpu.memory_space<any>> -> memref<1x512xf32, #tpu.memory_space<any>>
    %c0_i32_1 = arith.constant 0 : i32
    %c0_i32_2 = arith.constant 0 : i32
    %2 = tpu.memref_slice %arg2[%arg0, %c0_i32_1, %c0_i32_2] : memref<1x1x512xf32, #tpu.memory_space<any>> -> memref<1x1x512xf32, #tpu.memory_space<any>>
    %3 = tpu.memref_squeeze %2 : memref<1x1x512xf32, #tpu.memory_space<any>> -> memref<1x512xf32, #tpu.memory_space<any>>
    tpu.enqueue_dma source(%1 : memref<1x512xf32, #tpu.memory_space<any>>) target(%3 : memref<1x512xf32, #tpu.memory_space<any>>) target_semaphore(%arg3 : memref<!tpu.dma_semaphore, #tpu.memory_space<semaphore_mem>>)
    %c0_i32_3 = arith.constant 0 : i32
    %c0_i32_4 = arith.constant 0 : i32
    %4 = tpu.memref_slice %arg1[%arg0, %c0_i32_3, %c0_i32_4] : memref<1x1x512xf32, #tpu.memory_space<any>> -> memref<1x1x512xf32, #tpu.memory_space<any>>
    %5 = tpu.memref_squeeze %4 : memref<1x1x512xf32, #tpu.memory_space<any>> -> memref<1x512xf32, #tpu.memory_space<any>>
    %c0_i32_5 = arith.constant 0 : i32
    %c0_i32_6 = arith.constant 0 : i32
    %6 = tpu.memref_slice %arg2[%arg0, %c0_i32_5, %c0_i32_6] : memref<1x1x512xf32, #tpu.memory_space<any>> -> memref<1x1x512xf32, #tpu.memory_space<any>>
    %7 = tpu.memref_squeeze %6 : memref<1x1x512xf32, #tpu.memory_space<any>> -> memref<1x512xf32, #tpu.memory_space<any>>
    tpu.wait_dma2 semaphore(%arg3 : memref<!tpu.dma_semaphore, #tpu.memory_space<semaphore_mem>>) src(%5 : memref<1x512xf32, #tpu.memory_space<any>>) dst(%7 : memref<1x512xf32, #tpu.memory_space<any>>)
    return
  }
}

</mosaic_0001>

<bundles_post_ra>
// kernel: tpu_custom_call.1
= control target key start
LH: loop header
LB: loop body
LE: loop exit
PB: predicated region body
PF: predicated region fallthrough
CT: control target
= control target key end

     0   :  { %s39_s6 = smov [#allocation2]   ;;  %s40_s7 = smov [#allocation3]   ;;  %s58_s0 = inlined_call_operand.hbm [shape: f32[1,1,512], index: 0, kind: input, shape index: {}]   ;;  %s59_s1 = inlined_call_operand.hbm [shape: f32[1,1,512], index: 1, kind: output, shape index: {}]  }
   0x1   :  { %s41_s8 = smov 0  }
   0x2   :  { %23 = dma.general %s58_s0, 64, %s59_s1, %s39_s6, %s40_s7, [#allocation4], %s41_s8, 0  }
   0x3   :  { %37 = dma.done.wait [#allocation2], 64 }
   0x4   :  { %38 = vsyncadd [#allocation2], 4294967232 }
   0x5   :  { %27 = vsyncmov [#allocation2] }
   0x8   :  { %s28_s13 = vpop.sfrf %27 }
   0x9   :  { %p33_p0 = scmp.ne.s32.totalorder %s28_s13, 0 }
   0xb   :  { %32 = shalt.err (%p33_p0)  }

</bundles_post_ra>
